<compile_context>
chip_gen: v6e
topology: v6e:2x2x1
jax: 0.10.0
libtpu: 0.0.40
codegen_flags: <defaults>
</compile_context>

<pallas_src>
import jax
import jax.numpy as jnp
from jax import lax
from jax.experimental import pallas as pl
from jax.experimental.pallas import tpu as pltpu


def _round_up(a, b):
    return (a + b - 1) // b * b


def _cdiv(a, b):
    return (a + b - 1) // b


def _vmem_capacity_bytes():
    cap = 128 << 20
    try:
        info = pltpu.get_tpu_info()
        cap = int(getattr(info, "vmem_capacity_bytes", cap) or cap)
    except Exception:
        pass
    return cap


# --------------------------------------------------------------------------
# Kernels
# --------------------------------------------------------------------------
def _gather_score_kernel(xt_ref, src_ref, dst_ref, score_ref):
    """score = exp(-||x[src] - x[dst]||_2) with the gather done in-kernel.

    xt_ref    : (D, N)  node table, VMEM-resident across all grid steps.
    src_ref   : (1, TE) int32 source node ids for this edge tile.
    dst_ref   : (1, TE) int32 destination node ids.
    score_ref : (1, TE) f32 lane-dense output block.
    """
    n_nodes = xt_ref.shape[1]
    te = src_ref.shape[1]

    xt = xt_ref[...]                                         # (D, N) native dtype
    src = src_ref[...]                                       # (1, TE)
    dst = dst_ref[...]                                       # (1, TE)

    node = lax.broadcasted_iota(jnp.int32, (n_nodes, te), 0)  # (N, TE)
    # Signed one-hot selector: +1 at src row, -1 at dst row (exact in bf16/f32).
    sel = (node == src).astype(xt.dtype) - (node == dst).astype(xt.dtype)

    # diff[d, e] = x[src[e], d] - x[dst[e], d], via the otherwise-idle MXU.
    diff = jnp.dot(xt, sel,
                   preferred_element_type=jnp.float32,
                   precision=lax.Precision.HIGHEST)           # (D, TE) f32
    # TODO(synk): for D >= 512, accumulate over sublane chunks of D instead of
    # materializing the full (D, TE) diff block.
    sq = jnp.sum(diff * diff, axis=0, keepdims=True)          # (1, TE)
    score_ref[...] = jnp.exp(-jnp.sqrt(sq)).astype(score_ref.dtype)


def _streamed_score_kernel(src_ref, dst_ref, score_ref):
    """Fallback: pre-gathered (D, TE) embedding blocks streamed from HBM."""
    src = src_ref[...].astype(jnp.float32)                    # (D, TE)
    dst = dst_ref[...].astype(jnp.float32)                    # (D, TE)
    diff = src - dst
    sq = jnp.sum(diff * diff, axis=0, keepdims=True)          # (1, TE)
    score_ref[...] = jnp.exp(-jnp.sqrt(sq)).astype(score_ref.dtype)


# --------------------------------------------------------------------------
# Wrappers
# --------------------------------------------------------------------------
def _derive_resident_tile(E, N, D, itemsize, vmem_cap):
    """Pick tile_e for the resident-node-table path, or None if it won't fit."""
    # Leave generous headroom: v7x only has 64 MiB VMEM per TensorCore.
    budget = min(int(vmem_cap * 0.6), 48 << 20)
    table_bytes = 2 * D * N * itemsize            # conservative (double-buffered)
    per_edge = (2 * 2 * 4                         # two idx inputs, double-buffered
                + 2 * 4                           # output, double-buffered
                + 2 * N * 4                       # one-hot/select temporaries (f32)
                + 2 * D * 4)                      # diff temp + slack (f32)
    avail = budget - table_bytes
    if avail < 128 * per_edge:
        return None
    te = (avail // per_edge) // 128 * 128
    te = max(128, min(int(te), 16384))
    # Keep >= 2 grid steps so the "parallel" axis can shard across both
    # TensorCores on v7x (no effect on v5e/v6e).
    te = min(te, max(128, _round_up(_cdiv(E, 2), 128)))
    return te


def _derive_streamed_tile(E, D, itemsize, vmem_cap):
    budget = min(int(vmem_cap * 0.6), 48 << 20)
    per_edge = 2 * 2 * D * itemsize + 2 * D * 4 + 16
    te = max(128, min((budget // per_edge) // 128 * 128, 16384))
    te = min(te, max(128, _round_up(_cdiv(E, 2), 128)))
    return int(te)


def link_pred_scores(x, src_idx, dst_idx):
    """exp(-||x[src] - x[dst]||_2) per edge."""
    E = int(src_idx.shape[0])
    N, D = x.shape
    itemsize = jnp.dtype(x.dtype).itemsize
    src_idx = src_idx.astype(jnp.int32)
    dst_idx = dst_idx.astype(jnp.int32)

    vmem_cap = _vmem_capacity_bytes()
    vmem_limit = int(vmem_cap * 0.85)

    te = _derive_resident_tile(E, N, D, itemsize, vmem_cap)
    if te is not None:
        # --------- primary path: node table resident in VMEM, gather in-kernel
        e_pad = _round_up(max(E, 1), te)
        pad = e_pad - E
        if pad:
            src_idx = jnp.pad(src_idx, (0, pad))   # pad with node 0; tail dropped
            dst_idx = jnp.pad(dst_idx, (0, pad))
        src2 = src_idx.reshape(1, e_pad)
        dst2 = dst_idx.reshape(1, e_pad)
        xt = x.T                                   # (D, N), native dtype, read once

        cost = pl.CostEstimate(
            flops=int(2 * D * N * e_pad + 3 * D * e_pad),
            transcendentals=int(2 * e_pad),
            bytes_accessed=int(D * N * itemsize + 2 * e_pad * 4 + e_pad * 4),
        )
        out = pl.pallas_call(
            _gather_score_kernel,
            out_shape=jax.ShapeDtypeStruct((1, e_pad), jnp.float32),
            grid_spec=pltpu.PrefetchScalarGridSpec(
                num_scalar_prefetch=0,
                grid=(e_pad // te,),
                in_specs=[
                    pl.BlockSpec((D, N), lambda i: (0, 0)),   # resident table
                    pl.BlockSpec((1, te), lambda i: (0, i)),  # src ids
                    pl.BlockSpec((1, te), lambda i: (0, i)),  # dst ids
                ],
                out_specs=pl.BlockSpec((1, te), lambda i: (0, i)),
            ),
            compiler_params=pltpu.CompilerParams(
                dimension_semantics=("parallel",),
                vmem_limit_bytes=vmem_limit,
            ),
            cost_estimate=cost,
        )(xt, src2, dst2)
        return out[0, :E].astype(x.dtype)

    # --------- fallback: node table too large for VMEM; gather in XLA and
    # stream (D, te) embedding blocks in x's native dtype.
    te = _derive_streamed_tile(E, D, itemsize, vmem_cap)
    e_pad = _round_up(max(E, 1), te)
    pad = e_pad - E
    if pad:
        src_idx = jnp.pad(src_idx, (0, pad))
        dst_idx = jnp.pad(dst_idx, (0, pad))
    xt = x.T
    src_emb = jnp.take(xt, src_idx, axis=1)        # (D, e_pad), native dtype
    dst_emb = jnp.take(xt, dst_idx, axis=1)        # (D, e_pad), native dtype

    cost = pl.CostEstimate(
        flops=int(3 * D * e_pad),
        transcendentals=int(2 * e_pad),
        bytes_accessed=int(2 * D * e_pad * itemsize + e_pad * 4),
    )
    out = pl.pallas_call(
        _streamed_score_kernel,
        out_shape=jax.ShapeDtypeStruct((1, e_pad), jnp.float32),
        grid_spec=pltpu.PrefetchScalarGridSpec(
            num_scalar_prefetch=0,
            grid=(e_pad // te,),
            in_specs=[
                pl.BlockSpec((D, te), lambda i: (0, i)),
                pl.BlockSpec((D, te), lambda i: (0, i)),
            ],
            out_specs=pl.BlockSpec((1, te), lambda i: (0, i)),
        ),
        compiler_params=pltpu.CompilerParams(
            dimension_semantics=("parallel",),
            vmem_limit_bytes=vmem_limit,
        ),
        cost_estimate=cost,
    )(src_emb, dst_emb)
    return out[0, :E].astype(x.dtype)


# --------------------------------------------------------------------------
# Module-level plumbing (mirrors MsgLinkPredictor)
# --------------------------------------------------------------------------
def init_msg_link_predictor_params(key, emb_dim):
    """Deterministic init of the (unused-in-forward) Linear layers."""
    ks = jax.random.split(key, 6)
    bound = 1.0 / jnp.sqrt(emb_dim)

    def lin(kw, kb, out_dim):
        w = jax.random.uniform(kw, (out_dim, emb_dim), jnp.float32, -bound, bound)
        b = jax.random.uniform(kb, (out_dim,), jnp.float32, -bound, bound)
        return {"weight": w, "bias": b}

    return {
        "src_fc": lin(ks[0], ks[1], emb_dim),
        "dst_fc": lin(ks[2], ks[3], emb_dim),
        "out_fc": lin(ks[4], ks[5], 1),
    }


def msg_link_predictor_forward(params, x, pos_edges, neg_edges):
    """Mirrors MsgLinkPredictor.forward(x, pos_g, neg_g).

    pos_edges / neg_edges: (src_idx, dst_idx) int32 arrays of shape [E].
    params are unused in forward (faithful to the PyTorch module — the Linear
    layers are never applied there).
    """
    del params
    pos_src, pos_dst = pos_edges
    neg_src, neg_dst = neg_edges
    e_pos = pos_src.shape[0]

    # Single fused pallas_call for both edge sets.
    src_all = jnp.concatenate([pos_src, neg_src])
    dst_all = jnp.concatenate([pos_dst, neg_dst])
    scores = link_pred_scores(x, src_all, dst_all)
    return scores[:e_pos], scores[e_pos:]


if __name__ == "__main__":
    key = jax.random.PRNGKey(0)
    N, D = 16, 32          # num nodes, emb_dim
    E_pos, E_neg = 128, 128

    k_x, k_p, k_ps, k_pd, k_ns, k_nd = jax.random.split(key, 6)
    x = jax.random.normal(k_x, (N, D), jnp.float32)
    params = init_msg_link_predictor_params(k_p, D)

    pos_src = jax.random.randint(k_ps, (E_pos,), 0, N, jnp.int32)
    pos_dst = jax.random.randint(k_pd, (E_pos,), 0, N, jnp.int32)
    neg_src = jax.random.randint(k_ns, (E_neg,), 0, N, jnp.int32)
    neg_dst = jax.random.randint(k_nd, (E_neg,), 0, N, jnp.int32)

    pos_score, neg_score = msg_link_predictor_forward(
        params, x, (pos_src, pos_dst), (neg_src, neg_dst))
    jax.block_until_ready((pos_score, neg_score))

    # Pure-JAX reference check
    def ref(xv, s, d):
        return jnp.exp(-jnp.linalg.norm(xv[s] - xv[d], axis=-1))

    assert jnp.allclose(pos_score, ref(x, pos_src, pos_dst), atol=1e-5)
    assert jnp.allclose(neg_score, ref(x, neg_src, neg_dst), atol=1e-5)
    assert pos_score.shape == (E_pos,) and neg_score.shape == (E_neg,)

    print("KERNEL_OK")
</pallas_src>

<mosaic_0001>
module attributes {stable_mosaic.version = 11 : i64} {
  func.func @_gather_score_kernel(%arg0: i32, %arg1: memref<32x16xf32, #tpu.memory_space<vmem>>, %arg2: memref<1x128xi32, #tpu.memory_space<vmem>>, %arg3: memref<1x128xi32, #tpu.memory_space<vmem>>, %arg4: memref<1x128xf32, #tpu.memory_space<vmem>>) attributes {dimension_semantics = [#tpu.dimension_semantics<parallel>], iteration_bounds = array<i64: 2>, scalar_prefetch = 0 : i64, scratch_operands = 0 : i64, tpu.core_type = #tpu.core_type<tc>, window_params = [{pipeline_mode = #tpu.pipeline_mode<synchronous>, transform_indices = @transform_0, window_bounds = array<i64: 32, 16>}, {transform_indices = @transform_1, window_bounds = array<i64: 1, 128>}, {transform_indices = @transform_2, window_bounds = array<i64: 1, 128>}, {transform_indices = @transform_3, window_bounds = array<i64: 1, 128>}]} {
    %c0 = arith.constant 0 : index
    %c0_0 = arith.constant 0 : index
    %0 = vector.load %arg1[%c0, %c0_0] : memref<32x16xf32, #tpu.memory_space<vmem>>, vector<32x16xf32>
    %c0_1 = arith.constant 0 : index
    %c0_2 = arith.constant 0 : index
    %1 = vector.load %arg2[%c0_1, %c0_2] : memref<1x128xi32, #tpu.memory_space<vmem>>, vector<1x128xi32>
    %c0_3 = arith.constant 0 : index
    %c0_4 = arith.constant 0 : index
    %2 = vector.load %arg3[%c0_3, %c0_4] : memref<1x128xi32, #tpu.memory_space<vmem>>, vector<1x128xi32>
    %3 = tpu.iota {dimensions = array<i32: 0>} : vector<16x128xi32>
    %4 = vector.broadcast %1 : vector<1x128xi32> to vector<16x128xi32>
    %5 = arith.cmpi eq, %3, %4 : vector<16x128xi32>
    %6 = arith.extui %5 : vector<16x128xi1> to vector<16x128xi32>
    %7 = arith.sitofp %6 : vector<16x128xi32> to vector<16x128xf32>
    %8 = vector.broadcast %2 : vector<1x128xi32> to vector<16x128xi32>
    %9 = arith.cmpi eq, %3, %8 : vector<16x128xi32>
    %10 = arith.extui %9 : vector<16x128xi1> to vector<16x128xi32>
    %11 = arith.sitofp %10 : vector<16x128xi32> to vector<16x128xf32>
    %12 = arith.subf %7, %11 : vector<16x128xf32>
    %cst = arith.constant dense<0.000000e+00> : vector<32x128xf32>
    %13 = tpu.matmul %0, %12, %cst {dimension_numbers = #tpu.dot_dimension_numbers<[1], [0], [0], [1], [0, 0, 1, 1], [], []>, precision = #tpu.contract_precision<fp32>} : vector<32x16xf32>, vector<16x128xf32>, vector<32x128xf32> -> vector<32x128xf32>
    %14 = arith.mulf %13, %13 : vector<32x128xf32>
    %cst_5 = arith.constant dense<0.000000e+00> : vector<128xf32>
    %15 = vector.multi_reduction <add>, %14, %cst_5 [0] : vector<32x128xf32> to vector<128xf32>
    %16 = vector.shape_cast %15 : vector<128xf32> to vector<1x128xf32>
    %17 = math.sqrt %16 : vector<1x128xf32>
    %cst_6 = arith.constant 0.000000e+00 : f32
    %18 = vector.broadcast %cst_6 : f32 to vector<1x128xf32>
    %19 = arith.subf %18, %17 : vector<1x128xf32>
    %20 = math.exp %19 : vector<1x128xf32>
    %c0_7 = arith.constant 0 : index
    %c0_8 = arith.constant 0 : index
    %21 = vector.load %arg4[%c0_7, %c0_8] : memref<1x128xf32, #tpu.memory_space<vmem>>, vector<1x128xf32>
    tpu.vector_store %arg4[%c0_7, %c0_8], %20 {strides = array<i32>} : memref<1x128xf32, #tpu.memory_space<vmem>>, vector<1x128xf32>,
    return
  }
  func.func @transform_0(%arg0: i32) -> (i32, i32) {
    %c0_i32 = arith.constant 0 : i32
    %c0_i32_0 = arith.constant 0 : i32
    %c0_i32_1 = arith.constant 0 : i32
    return %c0_i32, %c0_i32_0 : i32, i32
  }
  func.func @transform_1(%arg0: i32) -> (i32, i32) {
    %c0_i32 = arith.constant 0 : i32
    %c0_i32_0 = arith.constant 0 : i32
    return %c0_i32, %arg0 : i32, i32
  }
  func.func @transform_2(%arg0: i32) -> (i32, i32) {
    %c0_i32 = arith.constant 0 : i32
    %c0_i32_0 = arith.constant 0 : i32
    return %c0_i32, %arg0 : i32, i32
  }
  func.func @transform_3(%arg0: i32) -> (i32, i32) {
    %c0_i32 = arith.constant 0 : i32
    %c0_i32_0 = arith.constant 0 : i32
    return %c0_i32, %arg0 : i32, i32
  }
}

</mosaic_0001>

<bundles_post_ra>
// kernel: tpu_custom_call.1
= control target key start
LH: loop header
LB: loop body
LE: loop exit
PB: predicated region body
PF: predicated region fallthrough
CT: control target
= control target key end

     0   :  { %8 = vsyncpa [#allocation3], 0  ;;  %s1290_s0 = inlined_call_operand.vmem [shape: f32[32,16], index: 0, kind: input, shape index: {}]   ;;  %s1291_s1 = inlined_call_operand.vmem [shape: s32[1,256], index: 1, kind: input, shape index: {}]   ;;  %s1292_s2 = inlined_call_operand.vmem [shape: s32[1,256], index: 2, kind: input, shape index: {}]   ;;  %s1293_s3 = inlined_call_operand.hbm [shape: f32[1,256], index: 3, kind: output, shape index: {}]  }
   0x1   :  { %10 = vsyncpa [#allocation3 + $0x1], 0  ;;  %s1143_s12 = smov 0   ;;  %s1145_s13 = smov 0  }
   0x2   :  { %s1147_s14 = smov 0   ;;  %s1149_s15 = smov 0  }
   0x3 LB: > { %s1164_s16 = sadd.s32 4294967295, %s1119_s15   ;;  %s906_s17 = sadd.s32 4294967294, %s1119_s15   ;;  %s1119_s15 = sphi %s1149_s15, %s1299_s15   ;;  %s1115_s14 = sphi %s1147_s14, %s1298_s14   ;;  %s1111_s13 = sphi %s1145_s13, %s1297_s13   ;;  %s1107_s12 = sphi %s1143_s12, %s1296_s12  }
   0x4   : > { %s1168_s18 = sadd.s32 1, %s1119_s15   ;;  %s96_s19 = sadd.s32 1, %s1115_s14 }
   0x5   : > { %s93_s20 = ssub.s32 %s1119_s15, %s1168_s18  ;;  %p106_p0 = scmp.ne.s32.totalorder %s1115_s14, %s1111_s13 }
   0x6   : > { %p94_p1 = scmp.eq.s32.totalorder %s93_s20, 0  ;;  %p107_p2 = scmp.eq.s32.totalorder %s1164_s16, 1 }
   0x7   : > { %p112_p3 = scmp.ne.s32.totalorder %s1111_s13, %s1107_s12  ;;  %p113_p4 = scmp.eq.s32.totalorder %s906_s17, 1 }
   0x8   : > { %s1179_s21 = scalar_select %p94_p1, %s1115_s14, %s96_s19  }
   0x9   : > { %p1181_p5 = por %p107_p2, %p106_p0  ;;  %p1185_p6 = por %p113_p4, %p112_p3 }
   0xa   : > { %p909_p7 = scmp.ge.s32.totalorder %s1119_s15, 1  ;;  %p146_p8 = scmp.lt.s32.totalorder %s1119_s15, 3 }
   0xc   : > { %p147_p9 = pnand %p909_p7, %p146_p8 }
   0xd   : > { %p170_p10 = scmp.lt.s32.totalorder (!%p147_p9), %s1164_s16, 1  ;;  %s168_s17 = sand.u32 (!%p147_p9), 1, %s1111_s13  }
   0xe   : > { %150 = sbr.rel (%p147_p9) target bundleno = 327 (0x147), region = 32  ;;  %s916_s19 = sshll.u32 (!%p147_p9), %s1164_s16, 4 }
   0xf   : > { %s169_s20 = scalar_lea.vmem (!%p147_p9), [#allocation2], %s168_s17  ;;  %s1255_s27 = scalar_lea.hbm (!%p147_p9), %s1293_s3, %s916_s19 }
  0x10   : > { %s845_s24 = sshll.u32 (!%p147_p9), %s169_s20, 4  ;;  %s833_s28 = scalar_lea.sflag (!%p147_p9), [#allocation3], %s168_s17  ;;  %s846_s24 = int_to_ptr.vmem [resolvable:$true] %s845_s24 }
  0x11   : > { %s1059_s29 = scalar_lea.vmem (!%p147_p9), %s846_s24, 16  ;;  %s1122_s30 = smov (!%p147_p9), [#allocation2]  }
  0x12   : > { %p1060_p11 = scmp.ne.s32.totalorder (!%p147_p9), %s846_s24, %s1059_s29  ;;  %s1063_s4 = sshll.u32 (!%p147_p9), %s1122_s30, 4  ;;  %s1064_s4 = int_to_ptr.vmem [resolvable:$false] %s1063_s4 }
  0x13   : > { %v182_v0 = vlaneseq  ;;  %v176_v1 = vld [vmem:[%s1290_s0] sm:$0xff]  ;;  %vm207_vm0 = vcmask 130048   ;;  %v177_v2 = vld [vmem:[%s1290_s0 + $0x8] sm:$0xff]  ;;  %v178_v3 = vld [vmem:[%s1290_s0 + $0x10] sm:$0xff]  ;;  %s171_s5 = scalar_select %p170_p10, %s1164_s16, 1  ;;  %v1121_v20 = vmov 0.0  }
  0x14   : > { %v209_v4 = vsel %vm207_vm0, %v176_v1, 0  ;;  %v212_v5 = vsel %vm207_vm0, %v177_v2, 0  ;;  %v215_v6 = vsel %vm207_vm0, %v178_v3, 0  ;;  %v179_v7 = vld [vmem:[%s1290_s0 + $0x18] sm:$0xff]  ;;  %p1061_p12 = pnand %p1060_p11, %p1181_p5  ;;  %s1065_s16 = scalar_lea.vmem %s1064_s4, 32 }
  0x15   : > { %v183_v8 = vshrl.u32 %v182_v0, 7  ;;  %v1205_v9 = vand.u32 4294901760, %v209_v4  ;;  %v1207_v10 = vand.u32 4294901760, %v212_v5  ;;  %v1209_v11 = vand.u32 4294901760, %v215_v6  ;;  %s172_s8 = scalar_lea.vmem %s1291_s1, %s171_s5  ;;  %s175_s11 = scalar_lea.vmem %s1292_s2, %s171_s5 }
  0x16   : > { %v218_v12 = vsel %vm207_vm0, %v179_v7, 0  ;;  %v910_v16 = vld [vmem:[%s172_s8] ss:$0 sm:$0xff]  ;;  %p1062_p13 = pneg %p1061_p12  ;;  %p1066_p0 = scmp.lt.s32.totalorder %s846_s24, %s1064_s4 }
  0x17   : > { %v184_v13 = vadd.s32 8, %v183_v8  ;;  %v1218_v14 = vsub.f32 %v209_v4, %v1205_v9  ;;  %v1221_v15 = vsub.f32 %v212_v5, %v1207_v10  ;;  %969 = vmatprep.mubr.f32.mxu1 %v1205_v9  ;;  %v913_v17 = vld [vmem:[%s175_s11] ss:$0 sm:$0xff]  ;;  %v1225_v18 = vsub.f32 %v215_v6, %v1209_v11  ;;  %p1067_p1 = scmp.lt.s32.totalorder %s1065_s16, %s1059_s29 }
  0x18   : > { %v1227_v19 = vand.u32 4294901760, %v218_v12  ;;  %vm189_vm3 = vcmp.eq.s32.totalorder %v183_v8, %v910_v16  ;;  %vm199_vm4 = vcmp.eq.s32.totalorder %v183_v8, %v913_v17 }
  0x19   : > { %vm190_vm1 = vcmp.eq.s32.totalorder %v184_v13, %v910_v16  ;;  %vm200_vm2 = vcmp.eq.s32.totalorder %v184_v13, %v913_v17  ;;  %v911_v23 = vsel %vm189_vm3, 1.0, %v1121_v20  ;;  %v914_v24 = vsel %vm199_vm4, 1.0, %v1121_v20  ;;  %p1068_p2 = por %p1067_p1, %p1066_p0 }
  0x1a   : > { %v912_v21 = vsel %vm190_vm1, 1.0, %v1121_v20  ;;  %v915_v22 = vsel %vm200_vm2, 1.0, %v1121_v20  ;;  %v205_v26 = vsub.f32 %v911_v23, %v914_v24  ;;  %v289_v27 = vand.u32 4294901760, %v1218_v14 }
  0x1b   : > { %v206_v25 = vsub.f32 %v912_v21, %v915_v22  ;;  %v299_v28 = vand.u32 4294901760, %v1221_v15  ;;  %v309_v29 = vand.u32 4294901760, %v1225_v18  ;;  %v318_v30 = vsub.f32 %v218_v12, %v1227_v19  ;;  %p1069_p3 = pnand %p1068_p2, %p1062_p13 }
  0x1c   : > { %v252_v32 = vand.u32 4294901760, %v205_v26  ;;  %v290_v33 = vsub.f32 %v1218_v14, %v289_v27 }
  0x1d   : > { %v249_v31 = vand.u32 4294901760, %v206_v25  ;;  %v300_v34 = vsub.f32 %v1221_v15, %v299_v28  ;;  %v310_v35 = vsub.f32 %v1225_v18, %v309_v29  ;;  %v319_v36 = vand.u32 4294901760, %v318_v30 }
  0x1e   : > { %v291_v37 = vand.u32 4294901760, %v290_v33  ;;  %v364_v40 = vsub.f32 %v205_v26, %v252_v32 }
  0x1f   : > { %955 = vmatprep.subr.mxu0 %v249_v31  ;;  %v301_v38 = vand.u32 4294901760, %v300_v34  ;;  %v357_v39 = vsub.f32 %v206_v25, %v249_v31  ;;  %v311_v41 = vand.u32 4294901760, %v310_v35  ;;  %v320_v42 = vsub.f32 %v318_v30, %v319_v36 }
  0x20   : > { %956 = vmatpush3.msra.mxu0 %v249_v31  ;;  %959 = vmatprep.mubr.f32.mxu0 %v291_v37  ;;  %v365_v44 = vand.u32 4294901760, %v364_v40 }
  0x21   : > { %957 = vmatprep.subr.mxu0 %v252_v32  ;;  %v358_v43 = vand.u32 4294901760, %v357_v39  ;;  %v321_v46 = vand.u32 4294901760, %v320_v42 }
  0x22   : > { %958 = vmatpush3.msra.mxu0 %v252_v32  ;;  %v366_v47 = vsub.f32 %v364_v40, %v365_v44 }
  0x23   : > { %960 = vmatmul.mubr.f32.vlgmr.msra.gmra.mxu0 %v301_v38  ;;  %v359_v45 = vsub.f32 %v357_v39, %v358_v43  ;;  %975 = vmatprep.subr.mxu0 %v357_v39 }
  0x24   : > { %962 = vmatprep.mubr.f32.mxu0 %v311_v41  ;;  %976 = vmatpush3.msra.mxu0 %v357_v39  ;;  %v367_v49 = vand.u32 4294901760, %v366_v47 }
  0x25   : > { %v360_v48 = vand.u32 4294901760, %v359_v45  ;;  %977 = vmatprep.subr.mxu0 %v364_v40 }
  0x26   : > { %978 = vmatpush3.msra.mxu0 %v364_v40 }
  0x27   : > { %965 = vmatprep.subr.mxu1 %v360_v48  ;;  %963 = vmatmul.mubr.f32.gmra.mxu0 %v321_v46 }
  0x28   : > { %966 = vmatpush3.msra.mxu1 %v360_v48  ;;  %979 = vmatprep.mubr.f32.mxu0 %v1218_v14 }
  0x29   : > { %967 = vmatprep.subr.mxu1 %v367_v49  ;;  %995 = vmatprep.subr.mxu0 %v358_v43 }
  0x2a   : > { %968 = vmatpush3.msra.mxu1 %v367_v49 }
  0x2b   : > { %970 = vmatmul.mubr.f32.vlgmr.msra.gmra.mxu1 %v1207_v10  ;;  %985 = vmatprep.subr.mxu1 %v249_v31 }
  0x2c   : > { %986 = vmatpush3.msra.mxu1 %v249_v31  ;;  %980 = vmatmul.mubr.f32.vlgmr.msra.gmra.mxu0 %v1221_v15 }
  0x2d   : > { %972 = vmatprep.mubr.f32.mxu1 %v1209_v11  ;;  %987 = vmatprep.subr.mxu1 %v252_v32 }
  0x2e   : > { %982 = vmatprep.mubr.f32.mxu0 %v1225_v18  ;;  %988 = vmatpush3.msra.mxu1 %v252_v32 }
  0x2f   : > { %973 = vmatmul.mubr.f32.gmra.mxu1 %v1227_v19  ;;  %996 = vmatpush3.msra.mxu0 %v358_v43 }
  0x30   : > { %983 = vmatmul.mubr.f32.gmra.mxu0 %v318_v30  ;;  %989 = vmatprep.mubr.f32.mxu1 %v289_v27 }
  0x31   : > { %997 = vmatprep.subr.mxu0 %v365_v44  ;;  %1005 = vmatprep.subr.mxu1 %v249_v31 }
  0x32   : > { %998 = vmatpush3.msra.mxu0 %v365_v44  ;;  %999 = vmatprep.mubr.f32.mxu0 %v1205_v9 }
  0x33   : > { %990 = vmatmul.mubr.f32.vlgmr.msra.gmra.mxu1 %v299_v28 }
  0x34   : > { %1006 = vmatpush3.msra.mxu1 %v249_v31  ;;  %1000 = vmatmul.mubr.f32.vlgmr.msra.gmra.mxu0 %v1207_v10 }
  0x35   : > { %992 = vmatprep.mubr.f32.mxu1 %v309_v29  ;;  %1007 = vmatprep.subr.mxu1 %v252_v32 }
  0x36   : > { %1002 = vmatprep.mubr.f32.mxu0 %v1209_v11  ;;  %1008 = vmatpush3.msra.mxu1 %v252_v32 }
  0x37   : > { %993 = vmatmul.mubr.f32.gmra.mxu1 %v319_v36 }
  0x38   : > { %1003 = vmatmul.mubr.f32.gmra.mxu0 %v1227_v19  ;;  %1009 = vmatprep.mubr.f32.mxu1 %v1205_v9 }
  0x3b   : > { %1010 = vmatmul.mubr.f32.vlgmr.msra.gmra.mxu1 %v1207_v10 }
  0x3c   : > { %1012 = vmatprep.mubr.f32.mxu1 %v1209_v11 }
  0x3f   : > { %1013 = vmatmul.mubr.f32.gmra.mxu1 %v1227_v19 }
  0xe3   : > { %v961_v50 = vpop.f32.mrf.mxu0 }
  0xe5   : > { %v293_v51 = vpop.f32.mrf.mxu0 }
  0xe7   : > { %v964_v52 = vpop.f32.mrf.mxu0 }
  0xe9   : > { %v313_v53 = vpop.f32.mrf.mxu0 }
  0xeb   : > { %v971_v54 = vpop.f32.mrf.mxu1 }
  0xec   : > { %v981_v55 = vpop.f32.mrf.mxu0  ;;  %v411_v61 = vadd.f32 %v971_v54, %v961_v50 }
  0xed   : > { %v404_v56 = vpop.f32.mrf.mxu1 }
  0xee   : > { %v498_v57 = vpop.f32.mrf.mxu0  ;;  %v405_v62 = vadd.f32 %v404_v56, %v293_v51  ;;  %v506_v3 = vadd.f32 %v981_v55, %v411_v61 }
  0xef   : > { %v974_v58 = vpop.f32.mrf.mxu1 }
  0xf0   : > { %v984_v59 = vpop.f32.mrf.mxu0  ;;  %v423_v4 = vadd.f32 %v974_v58, %v964_v52  ;;  %v499_v5 = vadd.f32 %v498_v57, %v405_v62 }
  0xf1   : > { %v416_v60 = vpop.f32.mrf.mxu1 }
  0xf2   : > { %v512_v63 = vpop.f32.mrf.mxu0  ;;  %v417_v6 = vadd.f32 %v416_v60, %v313_v53  ;;  %v520_v13 = vadd.f32 %v984_v59, %v423_v4 }
  0xf3   : > { %v991_v0 = vpop.f32.mrf.mxu1 }
  0xf4   : > { %v1001_v1 = vpop.f32.mrf.mxu0  ;;  %v603_v9 = vadd.f32 %v991_v0, %v506_v3  ;;  %v513_v14 = vadd.f32 %v512_v63, %v417_v6 }
  0xf5   : > { %v594_v2 = vpop.f32.mrf.mxu1 }
  0xf6   : > { %v695_v7 = vpop.f32.mrf.mxu0  ;;  %v595_v10 = vadd.f32 %v594_v2, %v499_v5  ;;  %v702_v16 = vadd.f32 %v1001_v1, %v603_v9 }
  0xf7   : > { %v994_v8 = vpop.f32.mrf.mxu1 }
  0xf8   : > { %v1004_v12 = vpop.f32.mrf.mxu0  ;;  %v619_v17 = vadd.f32 %v994_v8, %v520_v13  ;;  %v696_v18 = vadd.f32 %v695_v7, %v595_v10 }
  0xf9   : > { %v610_v11 = vpop.f32.mrf.mxu1 }
  0xfa   : > { %v611_v19 = vadd.f32 %v610_v11, %v513_v14  ;;  %v707_v20 = vpop.f32.mrf.mxu0  ;;  %v714_v25 = vadd.f32 %v1004_v12, %v619_v17 }
  0xfb   : > { %v1011_v15 = vpop.f32.mrf.mxu1 }
  0xfc   : > { %v793_v22 = vadd.f32 %v1011_v15, %v702_v16  ;;  %v708_v26 = vadd.f32 %v707_v20, %v611_v19 }
  0xfd   : > { %v786_v21 = vpop.f32.mrf.mxu1 }
  0xfe   : > { %v787_v23 = vadd.f32 %v786_v21, %v696_v18  ;;  %v809_v29 = vmul.f32 %v793_v22, %v793_v22 }
  0xff   : > { %v1014_v24 = vpop.f32.mrf.mxu1 }
 0x100   : > { %v808_v27 = vmul.f32 %v787_v23, %v787_v23  ;;  %v805_v30 = vadd.f32 %v1014_v24, %v714_v25 }
 0x101   : > { %v798_v28 = vpop.f32.mrf.mxu1 }
 0x102   : > { %v799_v31 = vadd.f32 %v798_v28, %v708_v26  ;;  %v812_v32 = vadd.f32 %v809_v29, %v808_v27  ;;  %v811_v34 = vmul.f32 %v805_v30, %v805_v30 }
 0x104   : > { %v810_v33 = vmul.f32 %v799_v31, %v799_v31 }
 0x106   : > { %v813_v35 = vadd.f32 %v812_v32, %v810_v33 }
 0x108   : > { %v814_v36 = vadd.f32 %v813_v35, %v811_v34 }
 0x10a   : > { %v815_v37 = vrot.slane %v814_v36, 4 }
 0x10c   : > { %v816_v38 = vadd.f32 %v815_v37, %v814_v36 }
 0x10e   : > { %v817_v39 = vrot.slane %v816_v38, 2 }
 0x110   : > { %v818_v40 = vadd.f32 %v817_v39, %v816_v38 }
 0x112   : > { %v819_v41 = vrot.slane %v818_v40, 1 }
 0x114   : > { %v820_v42 = vadd.f32 %v819_v41, %v818_v40 }
 0x116   : > { %1055 = vrsqrt.f32 %v820_v42  ;;  %vm823_vm5 = vcmp.eq.f32.partialorder %v820_v42, inf  ;;  %v826_v45 = vand.u32 2147483648, %v820_v42  ;;  %vm825_vm6 = vcmp.eq.f32.partialorder %v820_v42, 0.0 }
 0x123   : > { %v1056_v43 = vpop.eup %1055 }
 0x124   : > { %v822_v44 = vmul.f32 %v1056_v43, %v820_v42 }
 0x126   : > { %v824_v46 = vsel %vm823_vm5, %v820_v42, %v822_v44 }
 0x127   : > { %v827_v47 = vsel %vm825_vm6, %v826_v45, %v824_v46 }
 0x128   : > { %v828_v48 = vsub.f32 0.0, %v827_v47 }
 0x12a   : > { %v829_v49 = vmul.f32 1.442695, %v828_v48 }
 0x12c   : > { %1057 = vpow2.f32 %v829_v49 }
 0x139   : > { %v1058_v50 = vpop.eup %1057 }
 0x13a   : > { %831 = vst [vmem:[%s169_s20] sm:$0x1] %v1058_v50 }
 0x13b   : > { %1072 = shalt.err (!%p1069_p3)
}
 0x13c   : > { %s1073_s5 = scalar_lea.hbm %s1255_s27, 16  ;;  %s1077_s8 = scalar_lea.hbm %s1293_s3, 32 }
 0x13d   : > { %p1074_p4 = scmp.ne.s32.totalorder %s1255_s27, %s1073_s5  ;;  %p1078_p9 = scmp.lt.s32.totalorder %s1255_s27, %s1293_s3 }
 0x13e   : > { %p1079_p10 = scmp.lt.s32.totalorder %s1077_s8, %s1073_s5 }
 0x13f   : > { %p1075_p7 = pnand %p1074_p4, %p1181_p5 }
 0x140   : > { %p1080_p11 = por %p1079_p10, %p1078_p9 }
 0x141   : > { %p1076_p8 = pneg %p1075_p7 }
 0x143   : > { %p1081_p12 = pnand %p1080_p11, %p1076_p8 }
 0x145   : > { %1084 = shalt.err (!%p1081_p12)
}
 0x146   : > { %1015 = dma.vmem_to_hbm [thread:$0]  (%p1181_p5), %s846_s24, 16, %s1255_s27, %s833_s28  }
 0x147 PF: > { %p1021_p13 = scmp.ge.s32.totalorder %s1119_s15, 2  ;;  %s857_s11 = sand.u32 1, %s1107_s12  }
 0x148   : > { %s858_s17 = scalar_lea.sflag [#allocation3], %s857_s11 }
 0x149   : > { %p1018_p0 = pnand %p1021_p13, %p1185_p6 }
 0x14b   : > { %p1019_p1 = pneg %p1018_p0 }
 0x14d   : > { %1102 = dma.done.wait (%p1019_p1), %s858_s17, 16  }
 0x14e   : > { %1104 = vsyncadd (%p1019_p1), %s858_s17, 4294967280  ;;  %p13_p2 = scmp.ge.s32.totalorder %s1168_s18, 4   ;;  %s1296_s12 = smov %s1111_s13 }
 0x14f   : > { %s1297_s13 = smov %s1115_s14  ;;  %s1298_s14 = smov %s1179_s21 }
 0x150   : > { %s1299_s15 = smov %s1168_s18  ;;  %15 = sbr.rel (!%p13_p2) target bundleno = 3 (0x3), region = 70 }
 0x155   :  { %862 = vsyncpa [#allocation3], 1 }
 0x156   :  { %864 = vsyncpa [#allocation3 + $0x1], 1 }

</bundles_post_ra>
